<compile_context>
chip_gen: v5e
topology: v5e:2x2
jax: 0.10.0
libtpu: 0.0.40
codegen_flags: <defaults>
</compile_context>

<pallas_src>
import functools

import jax
import jax.numpy as jnp
import numpy as np
from jax.experimental import pallas as pl
from jax.experimental.pallas import tpu as pltpu


def attention_loc_regressor_kernel(vid_ref, qry_ref, vmask_ref, qmask_ref,
                                   mats_ref, vecs_ref,
                                   loc_ref, attw_ref, *, batch, lv, lq):
    f32 = jnp.float32
    NEG = -1e9  # matches masked_fill(-1000000000.0) in the PyTorch module

    vid = vid_ref[...]        # (B*Lv, D)
    qry = qry_ref[...]        # (B*Lq, D)
    vecs = vecs_ref[...]      # (4, D): [w2_v|0, 0|w2_q, fused bias c, padded mlp2 bias]
    w1 = mats_ref[0]          # (D, 2H): [feat2att_v^T | feat2att_q^T]

    # ---- stage 1: shared packed projection + tanh (one wide matmul per branch) ----
    tv = jnp.tanh(jnp.dot(vid, w1, preferred_element_type=f32))   # (B*Lv, 2H)
    tq = jnp.tanh(jnp.dot(qry, w1, preferred_element_type=f32))   # (B*Lq, 2H)

    # ---- stage 2: attention logits as columns; zero-padded rows pick the right half ----
    alpha_v = jnp.sum(tv * vecs[0:1, :], axis=-1, keepdims=True)  # (B*Lv, 1)
    alpha_q = jnp.sum(tq * vecs[1:2, :], axis=-1, keepdims=True)  # (B*Lq, 1)
    alpha_v = jnp.where(vmask_ref[...] == 0.0, NEG, alpha_v)
    alpha_q = jnp.where(qmask_ref[...] == 0.0, NEG, alpha_q)

    def pool_one(alpha_col, feats, length, b):
        # per-batch masked softmax (sublane axis) + weighted sum -> (1, D)
        a = alpha_col[b * length:(b + 1) * length, :]             # (L, 1)
        x = feats[b * length:(b + 1) * length, :]                 # (L, D)
        m = jnp.max(a, axis=0, keepdims=True)
        e = jnp.exp(a - m)
        w = e / jnp.sum(e, axis=0, keepdims=True)                 # (L, 1)
        return jnp.sum(x * w, axis=0, keepdims=True), w

    pool_v_rows, pool_q_rows, attw_rows = [], [], []
    for b in range(batch):                                        # B is tiny & static
        pv, wv = pool_one(alpha_v, vid, lv, b)
        pq, _ = pool_one(alpha_q, qry, lq, b)
        pool_v_rows.append(pv)
        pool_q_rows.append(pq)
        attw_rows.append(wv)
    pool_v = jnp.concatenate(pool_v_rows, axis=0)                 # (B, D)
    pool_q = jnp.concatenate(pool_q_rows, axis=0)                 # (B, D)
    attw_ref[...] = jnp.concatenate(attw_rows, axis=0)            # (B*Lv, 1)

    # ---- stage 3: fc_v/fc_q + MLP_reg[0] folded into A_v, A_q, c; ReLU; padded final linear ----
    h = (jnp.dot(pool_v, mats_ref[1], preferred_element_type=f32)
         + jnp.dot(pool_q, mats_ref[2], preferred_element_type=f32)
         + vecs[2:3, :])
    h = jnp.maximum(h, 0.0)
    # lane-dense (B, D) store; true loc lives in columns 0:2 (sliced in the wrapper)
    loc_ref[...] = jnp.dot(h, mats_ref[3], preferred_element_type=f32) + vecs[3:4, :]


def attention_loc_regressor(vid_feats, vid_masks, query_feats, query_masks, p):
    """vid_feats (B,Lv,D), vid_masks (B,Lv), query_feats (B,Lq,D), query_masks (B,Lq)."""
    B, Lv, D = vid_feats.shape
    Lq = query_feats.shape[1]
    H = D // 2
    f32 = jnp.float32

    # ---- fold / pack parameters (trace-time, pure linear algebra) ----
    w1 = jnp.concatenate([p["feat2att_v_w"].T, p["feat2att_q_w"].T], axis=1)   # (D, 2H)
    w2v = jnp.concatenate([p["to_alpha_v_w"][0], jnp.zeros((H,), f32)])        # (D,)
    w2q = jnp.concatenate([jnp.zeros((H,), f32), p["to_alpha_q_w"][0]])        # (D,)
    m1t = p["mlp1_w"].T                                                        # (2D, D)
    A_v = p["fc_v_w"].T @ m1t[:D]                                              # (D, D)
    A_q = p["fc_q_w"].T @ m1t[D:]                                              # (D, D)
    c = p["fc_v_b"] @ m1t[:D] + p["fc_q_b"] @ m1t[D:] + p["mlp1_b"]            # (D,)
    M3 = jnp.zeros((D, D), f32).at[:, :2].set(p["mlp2_w"].T)                   # padded (D, D)
    b3 = jnp.zeros((D,), f32).at[:2].set(p["mlp2_b"])                          # padded (D,)
    mats = jnp.stack([w1, A_v, A_q, M3])                                       # (4, D, D)
    vecs = jnp.stack([w2v, w2q, c, b3])                                        # (4, D)

    vid2d = vid_feats.reshape(B * Lv, D).astype(f32)
    qry2d = query_feats.reshape(B * Lq, D).astype(f32)
    vmask = vid_masks.reshape(B * Lv, 1).astype(f32)
    qmask = query_masks.reshape(B * Lq, 1).astype(f32)

    def full(shape):
        return pl.BlockSpec(shape, lambda i: (0,) * len(shape))

    kernel = functools.partial(attention_loc_regressor_kernel, batch=B, lv=Lv, lq=Lq)
    loc_pad, attw_col = pl.pallas_call(
        kernel,
        grid=(1,),   # whole batch in one step; tiny workload, grid overhead dominates otherwise
        in_specs=[full((B * Lv, D)), full((B * Lq, D)),
                  full((B * Lv, 1)), full((B * Lq, 1)),
                  full((4, D, D)), full((4, D))],
        out_specs=(full((B, D)), full((B * Lv, 1))),
        out_shape=(jax.ShapeDtypeStruct((B, D), f32),
                   jax.ShapeDtypeStruct((B * Lv, 1), f32)),
        compiler_params=pltpu.CompilerParams(dimension_semantics=("arbitrary",)),
    )(vid2d, qry2d, vmask, qmask, mats, vecs)

    loc = loc_pad[:, :2]
    attw = attw_col.reshape(B, Lv)
    return loc, attw


def reference_forward(vid_feats, vid_masks, query_feats, query_masks, p):
    """Plain-JAX replica of AttentionLocRegressor.forward."""
    def attentive_pool(feats, masks, w1, w2, fcw, fcb):
        attn_f = feats @ w1.T                       # (B, L, H)
        alpha = jnp.tanh(attn_f) @ w2.T             # (B, L, 1)
        alpha = jnp.where(masks[..., None] == 0.0, -1e9, alpha)
        attw = jax.nn.softmax(jnp.swapaxes(alpha, 1, 2), axis=2)   # (B, 1, L)
        att_feats = (attw @ feats)[:, 0, :]         # (B, D)
        att_feats = att_feats @ fcw.T + fcb
        return att_feats, attw[:, 0, :]

    sv, aw = attentive_pool(vid_feats, vid_masks,
                            p["feat2att_v_w"], p["to_alpha_v_w"], p["fc_v_w"], p["fc_v_b"])
    sq, _ = attentive_pool(query_feats, query_masks,
                           p["feat2att_q_w"], p["to_alpha_q_w"], p["fc_q_w"], p["fc_q_b"])
    s = jnp.concatenate([sv, sq], axis=1)
    h = jnp.maximum(s @ p["mlp1_w"].T + p["mlp1_b"], 0.0)
    loc = h @ p["mlp2_w"].T + p["mlp2_b"]
    return loc, aw


def init_params(key, D):
    H = D // 2
    ks = jax.random.split(key, 12)
    s = 0.2
    return {
        "feat2att_v_w": s * jax.random.normal(ks[0], (H, D), jnp.float32),
        "to_alpha_v_w": s * jax.random.normal(ks[1], (1, H), jnp.float32),
        "fc_v_w": s * jax.random.normal(ks[2], (D, D), jnp.float32),
        "fc_v_b": s * jax.random.normal(ks[3], (D,), jnp.float32),
        "feat2att_q_w": s * jax.random.normal(ks[4], (H, D), jnp.float32),
        "to_alpha_q_w": s * jax.random.normal(ks[5], (1, H), jnp.float32),
        "fc_q_w": s * jax.random.normal(ks[6], (D, D), jnp.float32),
        "fc_q_b": s * jax.random.normal(ks[7], (D,), jnp.float32),
        "mlp1_w": s * jax.random.normal(ks[8], (D, 2 * D), jnp.float32),
        "mlp1_b": s * jax.random.normal(ks[9], (D,), jnp.float32),
        "mlp2_w": s * jax.random.normal(ks[10], (2, D), jnp.float32),
        "mlp2_b": s * jax.random.normal(ks[11], (2,), jnp.float32),
    }


if __name__ == "__main__":
    B, Lv, Lq, D = 2, 16, 8, 32     # EMB_DIM=32
    key = jax.random.PRNGKey(0)
    k_vid, k_qry, k_prm = jax.random.split(key, 3)

    vid_feats = jax.random.normal(k_vid, (B, Lv, D), jnp.float32)
    query_feats = jax.random.normal(k_qry, (B, Lq, D), jnp.float32)

    # masks: 1 = valid, 0 = padded
    vm = np.ones((B, Lv), np.float32)
    vm[1, Lv - 5:] = 0.0
    qm = np.ones((B, Lq), np.float32)
    qm[0, Lq - 2:] = 0.0
    vid_masks = jnp.asarray(vm)
    query_masks = jnp.asarray(qm)

    params = init_params(k_prm, D)

    loc, attw = attention_loc_regressor(vid_feats, vid_masks, query_feats, query_masks, params)
    loc = jax.block_until_ready(loc)
    attw = jax.block_until_ready(attw)

    loc_ref, attw_ref = reference_forward(vid_feats, vid_masks, query_feats, query_masks, params)
    np.testing.assert_allclose(np.asarray(loc), np.asarray(loc_ref), atol=1e-4, rtol=1e-4)
    np.testing.assert_allclose(np.asarray(attw), np.asarray(attw_ref), atol=1e-4, rtol=1e-4)

    print("KERNEL_OK")
</pallas_src>

<mosaic_0001>
module attributes {stable_mosaic.version = 11 : i64} {
  func.func @attention_loc_regressor_kernel(%arg0: i32, %arg1: memref<32x32xf32, #tpu.memory_space<vmem>>, %arg2: memref<16x32xf32, #tpu.memory_space<vmem>>, %arg3: memref<32x1xf32, #tpu.memory_space<vmem>>, %arg4: memref<16x1xf32, #tpu.memory_space<vmem>>, %arg5: memref<4x32x32xf32, #tpu.memory_space<vmem>>, %arg6: memref<4x32xf32, #tpu.memory_space<vmem>>, %arg7: memref<2x32xf32, #tpu.memory_space<vmem>>, %arg8: memref<32x1xf32, #tpu.memory_space<vmem>>) attributes {dimension_semantics = [#tpu.dimension_semantics<arbitrary>], iteration_bounds = array<i64: 1>, scalar_prefetch = 0 : i64, scratch_operands = 0 : i64, tpu.core_type = #tpu.core_type<tc>, window_params = [{pipeline_mode = #tpu.pipeline_mode<synchronous>, transform_indices = @transform_0, window_bounds = array<i64: 32, 32>}, {pipeline_mode = #tpu.pipeline_mode<synchronous>, transform_indices = @transform_1, window_bounds = array<i64: 16, 32>}, {pipeline_mode = #tpu.pipeline_mode<synchronous>, transform_indices = @transform_2, window_bounds = array<i64: 32, 1>}, {pipeline_mode = #tpu.pipeline_mode<synchronous>, transform_indices = @transform_3, window_bounds = array<i64: 16, 1>}, {pipeline_mode = #tpu.pipeline_mode<synchronous>, transform_indices = @transform_4, window_bounds = array<i64: 4, 32, 32>}, {pipeline_mode = #tpu.pipeline_mode<synchronous>, transform_indices = @transform_5, window_bounds = array<i64: 4, 32>}, {pipeline_mode = #tpu.pipeline_mode<synchronous>, transform_indices = @transform_6, window_bounds = array<i64: 2, 32>}, {pipeline_mode = #tpu.pipeline_mode<synchronous>, transform_indices = @transform_7, window_bounds = array<i64: 32, 1>}]} {
    %c0 = arith.constant 0 : index
    %c0_0 = arith.constant 0 : index
    %0 = vector.load %arg1[%c0, %c0_0] : memref<32x32xf32, #tpu.memory_space<vmem>>, vector<32x32xf32>
    %c0_1 = arith.constant 0 : index
    %c0_2 = arith.constant 0 : index
    %1 = vector.load %arg2[%c0_1, %c0_2] : memref<16x32xf32, #tpu.memory_space<vmem>>, vector<16x32xf32>
    %c0_3 = arith.constant 0 : index
    %c0_4 = arith.constant 0 : index
    %2 = vector.load %arg6[%c0_3, %c0_4] : memref<4x32xf32, #tpu.memory_space<vmem>>, vector<4x32xf32>
    %c0_5 = arith.constant 0 : index
    %c0_6 = arith.constant 0 : index
    %c0_7 = arith.constant 0 : index
    %3 = vector.load %arg5[%c0_5, %c0_6, %c0_7] : memref<4x32x32xf32, #tpu.memory_space<vmem>>, vector<1x32x32xf32>
    %4 = vector.shape_cast %3 : vector<1x32x32xf32> to vector<32x32xf32>
    %cst = arith.constant dense<0.000000e+00> : vector<32x32xf32>
    %5 = tpu.matmul %0, %4, %cst {dimension_numbers = #tpu.dot_dimension_numbers<[1], [0], [0], [1], [0, 0, 1, 1], [], []>} : vector<32x32xf32>, vector<32x32xf32>, vector<32x32xf32> -> vector<32x32xf32>
    %6 = math.tanh %5 : vector<32x32xf32>
    %cst_8 = arith.constant dense<0.000000e+00> : vector<16x32xf32>
    %7 = tpu.matmul %1, %4, %cst_8 {dimension_numbers = #tpu.dot_dimension_numbers<[1], [0], [0], [1], [0, 0, 1, 1], [], []>} : vector<16x32xf32>, vector<32x32xf32>, vector<16x32xf32> -> vector<16x32xf32>
    %8 = math.tanh %7 : vector<16x32xf32>
    %9 = vector.extract_strided_slice %2 {offsets = [0, 0], sizes = [1, 32], strides = [1, 1]} : vector<4x32xf32> to vector<1x32xf32>
    %10 = vector.broadcast %9 : vector<1x32xf32> to vector<32x32xf32>
    %11 = arith.mulf %6, %10 : vector<32x32xf32>
    %cst_9 = arith.constant dense<0.000000e+00> : vector<32xf32>
    %12 = vector.multi_reduction <add>, %11, %cst_9 [1] : vector<32x32xf32> to vector<32xf32>
    %13 = vector.shape_cast %12 : vector<32xf32> to vector<32x1xf32>
    %14 = vector.extract_strided_slice %2 {offsets = [1, 0], sizes = [1, 32], strides = [1, 1]} : vector<4x32xf32> to vector<1x32xf32>
    %15 = vector.broadcast %14 : vector<1x32xf32> to vector<16x32xf32>
    %16 = arith.mulf %8, %15 : vector<16x32xf32>
    %cst_10 = arith.constant dense<0.000000e+00> : vector<16xf32>
    %17 = vector.multi_reduction <add>, %16, %cst_10 [1] : vector<16x32xf32> to vector<16xf32>
    %18 = vector.shape_cast %17 : vector<16xf32> to vector<16x1xf32>
    %c0_11 = arith.constant 0 : index
    %c0_12 = arith.constant 0 : index
    %19 = vector.load %arg3[%c0_11, %c0_12] : memref<32x1xf32, #tpu.memory_space<vmem>>, vector<32x1xf32>
    %cst_13 = arith.constant 0.000000e+00 : f32
    %20 = vector.broadcast %cst_13 : f32 to vector<32x1xf32>
    %21 = arith.cmpf oeq, %19, %20 : vector<32x1xf32>
    %cst_14 = arith.constant -1.000000e+09 : f32
    %22 = vector.broadcast %cst_14 : f32 to vector<32x1xf32>
    %23 = arith.select %21, %22, %13 : vector<32x1xi1>, vector<32x1xf32>
    %c0_15 = arith.constant 0 : index
    %c0_16 = arith.constant 0 : index
    %24 = vector.load %arg4[%c0_15, %c0_16] : memref<16x1xf32, #tpu.memory_space<vmem>>, vector<16x1xf32>
    %cst_17 = arith.constant 0.000000e+00 : f32
    %25 = vector.broadcast %cst_17 : f32 to vector<16x1xf32>
    %26 = arith.cmpf oeq, %24, %25 : vector<16x1xf32>
    %cst_18 = arith.constant -1.000000e+09 : f32
    %27 = vector.broadcast %cst_18 : f32 to vector<16x1xf32>
    %28 = arith.select %26, %27, %18 : vector<16x1xi1>, vector<16x1xf32>
    %29 = vector.extract_strided_slice %23 {offsets = [0, 0], sizes = [16, 1], strides = [1, 1]} : vector<32x1xf32> to vector<16x1xf32>
    %30 = vector.extract_strided_slice %0 {offsets = [0, 0], sizes = [16, 32], strides = [1, 1]} : vector<32x32xf32> to vector<16x32xf32>
    %cst_19 = arith.constant dense<0xFF800000> : vector<1xf32>
    %31 = vector.multi_reduction <maximumf>, %29, %cst_19 [0] : vector<16x1xf32> to vector<1xf32>
    %32 = vector.shape_cast %31 : vector<1xf32> to vector<1x1xf32>
    %33 = vector.broadcast %32 : vector<1x1xf32> to vector<16x1xf32>
    %34 = arith.subf %29, %33 : vector<16x1xf32>
    %35 = math.exp %34 : vector<16x1xf32>
    %cst_20 = arith.constant dense<0.000000e+00> : vector<1xf32>
    %36 = vector.multi_reduction <add>, %35, %cst_20 [0] : vector<16x1xf32> to vector<1xf32>
    %37 = vector.shape_cast %36 : vector<1xf32> to vector<1x1xf32>
    %38 = vector.broadcast %37 : vector<1x1xf32> to vector<16x1xf32>
    %39 = arith.divf %35, %38 : vector<16x1xf32>
    %40 = vector.broadcast %39 : vector<16x1xf32> to vector<16x32xf32>
    %41 = arith.mulf %30, %40 : vector<16x32xf32>
    %cst_21 = arith.constant dense<0.000000e+00> : vector<32xf32>
    %42 = vector.multi_reduction <add>, %41, %cst_21 [0] : vector<16x32xf32> to vector<32xf32>
    %43 = vector.shape_cast %42 : vector<32xf32> to vector<1x32xf32>
    %44 = vector.extract_strided_slice %28 {offsets = [0, 0], sizes = [8, 1], strides = [1, 1]} : vector<16x1xf32> to vector<8x1xf32>
    %45 = vector.extract_strided_slice %1 {offsets = [0, 0], sizes = [8, 32], strides = [1, 1]} : vector<16x32xf32> to vector<8x32xf32>
    %cst_22 = arith.constant dense<0xFF800000> : vector<1xf32>
    %46 = vector.multi_reduction <maximumf>, %44, %cst_22 [0] : vector<8x1xf32> to vector<1xf32>
    %47 = vector.shape_cast %46 : vector<1xf32> to vector<1x1xf32>
    %48 = vector.broadcast %47 : vector<1x1xf32> to vector<8x1xf32>
    %49 = arith.subf %44, %48 : vector<8x1xf32>
    %50 = math.exp %49 : vector<8x1xf32>
    %cst_23 = arith.constant dense<0.000000e+00> : vector<1xf32>
    %51 = vector.multi_reduction <add>, %50, %cst_23 [0] : vector<8x1xf32> to vector<1xf32>
    %52 = vector.shape_cast %51 : vector<1xf32> to vector<1x1xf32>
    %53 = vector.broadcast %52 : vector<1x1xf32> to vector<8x1xf32>
    %54 = arith.divf %50, %53 : vector<8x1xf32>
    %55 = vector.broadcast %54 : vector<8x1xf32> to vector<8x32xf32>
    %56 = arith.mulf %45, %55 : vector<8x32xf32>
    %cst_24 = arith.constant dense<0.000000e+00> : vector<32xf32>
    %57 = vector.multi_reduction <add>, %56, %cst_24 [0] : vector<8x32xf32> to vector<32xf32>
    %58 = vector.shape_cast %57 : vector<32xf32> to vector<1x32xf32>
    %59 = vector.extract_strided_slice %23 {offsets = [16, 0], sizes = [16, 1], strides = [1, 1]} : vector<32x1xf32> to vector<16x1xf32>
    %60 = vector.extract_strided_slice %0 {offsets = [16, 0], sizes = [16, 32], strides = [1, 1]} : vector<32x32xf32> to vector<16x32xf32>
    %cst_25 = arith.constant dense<0xFF800000> : vector<1xf32>
    %61 = vector.multi_reduction <maximumf>, %59, %cst_25 [0] : vector<16x1xf32> to vector<1xf32>
    %62 = vector.shape_cast %61 : vector<1xf32> to vector<1x1xf32>
    %63 = vector.broadcast %62 : vector<1x1xf32> to vector<16x1xf32>
    %64 = arith.subf %59, %63 : vector<16x1xf32>
    %65 = math.exp %64 : vector<16x1xf32>
    %cst_26 = arith.constant dense<0.000000e+00> : vector<1xf32>
    %66 = vector.multi_reduction <add>, %65, %cst_26 [0] : vector<16x1xf32> to vector<1xf32>
    %67 = vector.shape_cast %66 : vector<1xf32> to vector<1x1xf32>
    %68 = vector.broadcast %67 : vector<1x1xf32> to vector<16x1xf32>
    %69 = arith.divf %65, %68 : vector<16x1xf32>
    %70 = vector.broadcast %69 : vector<16x1xf32> to vector<16x32xf32>
    %71 = arith.mulf %60, %70 : vector<16x32xf32>
    %cst_27 = arith.constant dense<0.000000e+00> : vector<32xf32>
    %72 = vector.multi_reduction <add>, %71, %cst_27 [0] : vector<16x32xf32> to vector<32xf32>
    %73 = vector.shape_cast %72 : vector<32xf32> to vector<1x32xf32>
    %74 = vector.extract_strided_slice %28 {offsets = [8, 0], sizes = [8, 1], strides = [1, 1]} : vector<16x1xf32> to vector<8x1xf32>
    %75 = vector.extract_strided_slice %1 {offsets = [8, 0], sizes = [8, 32], strides = [1, 1]} : vector<16x32xf32> to vector<8x32xf32>
    %cst_28 = arith.constant dense<0xFF800000> : vector<1xf32>
    %76 = vector.multi_reduction <maximumf>, %74, %cst_28 [0] : vector<8x1xf32> to vector<1xf32>
    %77 = vector.shape_cast %76 : vector<1xf32> to vector<1x1xf32>
    %78 = vector.broadcast %77 : vector<1x1xf32> to vector<8x1xf32>
    %79 = arith.subf %74, %78 : vector<8x1xf32>
    %80 = math.exp %79 : vector<8x1xf32>
    %cst_29 = arith.constant dense<0.000000e+00> : vector<1xf32>
    %81 = vector.multi_reduction <add>, %80, %cst_29 [0] : vector<8x1xf32> to vector<1xf32>
    %82 = vector.shape_cast %81 : vector<1xf32> to vector<1x1xf32>
    %83 = vector.broadcast %82 : vector<1x1xf32> to vector<8x1xf32>
    %84 = arith.divf %80, %83 : vector<8x1xf32>
    %85 = vector.broadcast %84 : vector<8x1xf32> to vector<8x32xf32>
    %86 = arith.mulf %75, %85 : vector<8x32xf32>
    %cst_30 = arith.constant dense<0.000000e+00> : vector<32xf32>
    %87 = vector.multi_reduction <add>, %86, %cst_30 [0] : vector<8x32xf32> to vector<32xf32>
    %88 = vector.shape_cast %87 : vector<32xf32> to vector<1x32xf32>
    %89 = tpu.concatenate %43, %73 in 0 : vector<1x32xf32>, vector<1x32xf32> -> vector<2x32xf32>
    %90 = tpu.concatenate %58, %88 in 0 : vector<1x32xf32>, vector<1x32xf32> -> vector<2x32xf32>
    %91 = tpu.concatenate %39, %69 in 0 : vector<16x1xf32>, vector<16x1xf32> -> vector<32x1xf32>
    %c0_31 = arith.constant 0 : index
    %c0_32 = arith.constant 0 : index
    %92 = vector.load %arg8[%c0_31, %c0_32] : memref<32x1xf32, #tpu.memory_space<vmem>>, vector<32x1xf32>
    tpu.vector_store %arg8[%c0_31, %c0_32], %91 {strides = array<i32>} : memref<32x1xf32, #tpu.memory_space<vmem>>, vector<32x1xf32>,
    %c1 = arith.constant 1 : index
    %c0_33 = arith.constant 0 : index
    %c0_34 = arith.constant 0 : index
    %93 = vector.load %arg5[%c1, %c0_33, %c0_34] : memref<4x32x32xf32, #tpu.memory_space<vmem>>, vector<1x32x32xf32>
    %94 = vector.shape_cast %93 : vector<1x32x32xf32> to vector<32x32xf32>
    %cst_35 = arith.constant dense<0.000000e+00> : vector<2x32xf32>
    %95 = tpu.matmul %89, %94, %cst_35 {dimension_numbers = #tpu.dot_dimension_numbers<[1], [0], [0], [1], [0, 0, 1, 1], [], []>} : vector<2x32xf32>, vector<32x32xf32>, vector<2x32xf32> -> vector<2x32xf32>
    %c2 = arith.constant 2 : index
    %c0_36 = arith.constant 0 : index
    %c0_37 = arith.constant 0 : index
    %96 = vector.load %arg5[%c2, %c0_36, %c0_37] : memref<4x32x32xf32, #tpu.memory_space<vmem>>, vector<1x32x32xf32>
    %97 = vector.shape_cast %96 : vector<1x32x32xf32> to vector<32x32xf32>
    %cst_38 = arith.constant dense<0.000000e+00> : vector<2x32xf32>
    %98 = tpu.matmul %90, %97, %cst_38 {dimension_numbers = #tpu.dot_dimension_numbers<[1], [0], [0], [1], [0, 0, 1, 1], [], []>} : vector<2x32xf32>, vector<32x32xf32>, vector<2x32xf32> -> vector<2x32xf32>
    %99 = arith.addf %95, %98 : vector<2x32xf32>
    %100 = vector.extract_strided_slice %2 {offsets = [2, 0], sizes = [1, 32], strides = [1, 1]} : vector<4x32xf32> to vector<1x32xf32>
    %101 = vector.broadcast %100 : vector<1x32xf32> to vector<2x32xf32>
    %102 = arith.addf %99, %101 : vector<2x32xf32>
    %cst_39 = arith.constant 0.000000e+00 : f32
    %103 = vector.broadcast %cst_39 : f32 to vector<2x32xf32>
    %104 = arith.maximumf %102, %103 : vector<2x32xf32>
    %c3 = arith.constant 3 : index
    %c0_40 = arith.constant 0 : index
    %c0_41 = arith.constant 0 : index
    %105 = vector.load %arg5[%c3, %c0_40, %c0_41] : memref<4x32x32xf32, #tpu.memory_space<vmem>>, vector<1x32x32xf32>
    %106 = vector.shape_cast %105 : vector<1x32x32xf32> to vector<32x32xf32>
    %cst_42 = arith.constant dense<0.000000e+00> : vector<2x32xf32>
    %107 = tpu.matmul %104, %106, %cst_42 {dimension_numbers = #tpu.dot_dimension_numbers<[1], [0], [0], [1], [0, 0, 1, 1], [], []>} : vector<2x32xf32>, vector<32x32xf32>, vector<2x32xf32> -> vector<2x32xf32>
    %108 = vector.extract_strided_slice %2 {offsets = [3, 0], sizes = [1, 32], strides = [1, 1]} : vector<4x32xf32> to vector<1x32xf32>
    %109 = vector.broadcast %108 : vector<1x32xf32> to vector<2x32xf32>
    %110 = arith.addf %107, %109 : vector<2x32xf32>
    %c0_43 = arith.constant 0 : index
    %c0_44 = arith.constant 0 : index
    %111 = vector.load %arg7[%c0_43, %c0_44] : memref<2x32xf32, #tpu.memory_space<vmem>>, vector<2x32xf32>
    tpu.vector_store %arg7[%c0_43, %c0_44], %110 {strides = array<i32>} : memref<2x32xf32, #tpu.memory_space<vmem>>, vector<2x32xf32>,
    return
  }
  func.func @transform_0(%arg0: i32) -> (i32, i32) {
    %c0_i32 = arith.constant 0 : i32
    %c0_i32_0 = arith.constant 0 : i32
    %c0_i32_1 = arith.constant 0 : i32
    return %c0_i32, %c0_i32_0 : i32, i32
  }
  func.func @transform_1(%arg0: i32) -> (i32, i32) {
    %c0_i32 = arith.constant 0 : i32
    %c0_i32_0 = arith.constant 0 : i32
    %c0_i32_1 = arith.constant 0 : i32
    return %c0_i32, %c0_i32_0 : i32, i32
  }
  func.func @transform_2(%arg0: i32) -> (i32, i32) {
    %c0_i32 = arith.constant 0 : i32
    %c0_i32_0 = arith.constant 0 : i32
    %c0_i32_1 = arith.constant 0 : i32
    return %c0_i32, %c0_i32_0 : i32, i32
  }
  func.func @transform_3(%arg0: i32) -> (i32, i32) {
    %c0_i32 = arith.constant 0 : i32
    %c0_i32_0 = arith.constant 0 : i32
    %c0_i32_1 = arith.constant 0 : i32
    return %c0_i32, %c0_i32_0 : i32, i32
  }
  func.func @transform_4(%arg0: i32) -> (i32, i32, i32) {
    %c0_i32 = arith.constant 0 : i32
    %c0_i32_0 = arith.constant 0 : i32
    %c0_i32_1 = arith.constant 0 : i32
    %c0_i32_2 = arith.constant 0 : i32
    return %c0_i32, %c0_i32_0, %c0_i32_1 : i32, i32, i32
  }
  func.func @transform_5(%arg0: i32) -> (i32, i32) {
    %c0_i32 = arith.constant 0 : i32
    %c0_i32_0 = arith.constant 0 : i32
    %c0_i32_1 = arith.constant 0 : i32
    return %c0_i32, %c0_i32_0 : i32, i32
  }
  func.func @transform_6(%arg0: i32) -> (i32, i32) {
    %c0_i32 = arith.constant 0 : i32
    %c0_i32_0 = arith.constant 0 : i32
    %c0_i32_1 = arith.constant 0 : i32
    return %c0_i32, %c0_i32_0 : i32, i32
  }
  func.func @transform_7(%arg0: i32) -> (i32, i32) {
    %c0_i32 = arith.constant 0 : i32
    %c0_i32_0 = arith.constant 0 : i32
    %c0_i32_1 = arith.constant 0 : i32
    return %c0_i32, %c0_i32_0 : i32, i32
  }
}

</mosaic_0001>

<bundles_post_ra>
// kernel: tpu_custom_call.1
= control target key start
LH: loop header
LB: loop body
LE: loop exit
PB: predicated region body
PF: predicated region fallthrough
CT: control target
= control target key end

     0   :  { %13 = vsyncpa [#allocation3], 0  ;;  %s853_s0 = inlined_call_operand.vmem [shape: f32[32,32], index: 0, kind: input, shape index: {}]   ;;  %s854_s1 = inlined_call_operand.vmem [shape: f32[16,32], index: 1, kind: input, shape index: {}]   ;;  %s855_s2 = inlined_call_operand.vmem [shape: f32[32,1], index: 2, kind: input, shape index: {}]   ;;  %s856_s3 = inlined_call_operand.vmem [shape: f32[16,1], index: 3, kind: input, shape index: {}]   ;;  %s857_s4 = inlined_call_operand.hbm [shape: f32[4,32,32], index: 4, kind: input, shape index: {}]   ;;  %s858_s5 = inlined_call_operand.hbm [shape: f32[4,32], index: 5, kind: input, shape index: {}]   ;;  %s859_s6 = inlined_call_operand.hbm [shape: f32[2,32], index: 6, kind: output, shape index: {0}]   ;;  %s860_s7 = inlined_call_operand.vmem [shape: f32[32,1], index: 7, kind: output, shape index: {1}]  }
   0x1   :  { %14 = vsyncpa [#allocation6], 0 }
   0x2   :  { %15 = vsyncpa [#allocation4], 0  ;;  %s28_s26 = sshll.u32 %s857_s4, 4  ;;  %s652_s27 = smov [#allocation2]   ;;  %s29_s26 = int_to_ptr.hbm [resolvable:$true] %s28_s26 }
   0x3   :  { %s30_s28 = sshll.u32 %s652_s27, 4  ;;  %s42_s8 = sshll.u32 %s858_s5, 4  ;;  %s31_s28 = int_to_ptr.vmem [resolvable:$true] %s30_s28  ;;  %s43_s8 = int_to_ptr.hbm [resolvable:$true] %s42_s8 }
   0x4   :  { %s653_s9 = smov 128   ;;  %s654_s10 = smov 8  }
   0x5   :  { %36 = dma.hbm_to_vmem [thread:$0]  %s29_s26, 2048, %s31_s28, [#allocation3], %s653_s9, %s653_s9, %s654_s10  }
   0x6   :  { %s655_s11 = smov [#allocation5]  }
   0x7   :  { %s44_s12 = sshll.u32 %s655_s11, 4  ;;  %s45_s12 = int_to_ptr.vmem [resolvable:$true] %s44_s12 }
   0x8   :  { %47 = dma.hbm_to_vmem [thread:$0]  %s43_s8, 64, %s45_s12, [#allocation6]  }
   0x9   :  { %646 = dma.done.wait [#allocation3], 2048  }
   0xa   :  { %647 = vsyncadd [#allocation3], 4294965248 }
   0xb   :  { %648 = dma.done.wait [#allocation6], 64  }
   0xc   :  { %649 = vsyncadd [#allocation6], 4294967232  ;;  %v66_v0 = vld [vmem:[#allocation2 + $0x18] sm:$0xff]  ;;  %v65_v1 = vld [vmem:[#allocation2 + $0x10] sm:$0xff]  ;;  %vm67_vm0 = vcmask 261120   ;;  %vm188_vm2 = vcmask 7168  }
   0xd   :  { %92 = vmatpush.msra.mxu0 %v66_v0  ;;  %131 = vmatpush.msra.mxu1 %v66_v0  ;;  %v64_v2 = vld [vmem:[#allocation2 + $0x8] sm:$0xff]  ;;  %v63_v3 = vld [vmem:[#allocation2] sm:$0xff]  ;;  %v717_v6 = vld [vmem:[%s853_s0 + $0x18] sm:$0xff]  ;;  %s505_s17 = sshll.u32 %s859_s6, 4  ;;  %s506_s17 = int_to_ptr.hbm [resolvable:$true] %s505_s17 }
   0xe   :  { %529 = vmatpush.msra.mxu3 %v66_v0  ;;  %v707_v4 = vld [vmem:[%s853_s0] sm:$0xff]  ;;  %v728_v7 = vld [vmem:[%s853_s0 + $0x8] sm:$0xff]  ;;  %v742_v9 = vld [vmem:[%s853_s0 + $0x10] sm:$0xff] }
   0xf   :  { %93 = vmatpush.msra.mxu0 %v65_v1  ;;  %132 = vmatpush.msra.mxu1 %v65_v1  ;;  %v712_v5 = vld [vmem:[%s854_s1] sm:$0xff]  ;;  %v733_v8 = vld [vmem:[%s854_s1 + $0x8] sm:$0xff] }
  0x10   :  { %530 = vmatpush.msra.mxu3 %v65_v1  ;;  %v746_v12 = vld [vmem:[#allocation5] sm:$0xf]  ;;  %v171_v43 = vld [vmem:[%s855_s2 + $0x8] sm:$0xff] }
  0x11   :  { %94 = vmatpush.msra.mxu0 %v64_v2  ;;  %133 = vmatpush.msra.mxu1 %v64_v2  ;;  %v144_v13 = vperm.slane %v746_v12, 0  ;;  %v161_v14 = vperm.slane %v746_v12, 1  ;;  %v182_v37 = vld [vmem:[%s856_s3] sm:$0xff]  ;;  %v183_v45 = vld [vmem:[%s856_s3 + $0x8] sm:$0xff]  ;;  %vm175_vm4 = vcmp.eq.f32.partialorder %v171_v43, 0.0 }
  0x12   :  { %531 = vmatpush.msra.mxu3 %v64_v2  ;;  %vm184_vm1 = vcmp.eq.f32.partialorder %v182_v37, 0.0  ;;  %v170_v40 = vld [vmem:[%s855_s2] sm:$0xff]  ;;  %vm185_vm5 = vcmp.eq.f32.partialorder %v183_v45, 0.0 }
  0x13   :  { %95 = vmatpush.msra.mxu0 %v63_v3  ;;  %134 = vmatpush.msra.mxu1 %v63_v3  ;;  %vm174_vm3 = vcmp.eq.f32.partialorder %v170_v40, 0.0 }
  0x14   :  { %520 = vmatmul.msk.f32.vlgmr.msra.gmra.mxu0 %vm67_vm0, %v707_v4  ;;  %524 = vmatmul.msk.f32.vlgmr.msra.gmra.mxu1 %vm67_vm0, %v712_v5 }
  0x15   :  { %532 = vmatpush.msra.mxu3 %v63_v3 }
  0x16   :  { %523 = vmatmul.msk.f32.vlgmr.msra.gmra.mxu3 %vm67_vm0, %v717_v6 }
  0x1c   :  { %521 = vmatmul.msk.f32.gmra.mxu0 %vm67_vm0, %v728_v7  ;;  %525 = vmatmul.msk.f32.gmra.mxu1 %vm67_vm0, %v733_v8 }
  0x24   :  { %522 = vmatmul.msk.f32.gmra.mxu0 %vm67_vm0, %v742_v9 }
  0x91   :  { %v97_v10 = vpop.f32.mrf.mxu0  ;;  %v136_v11 = vpop.f32.mrf.mxu1 }
  0x92   :  { %542 = vtanh.f32 %v97_v10  ;;  %v172_v10 = vld [vmem:[%s855_s2 + $0x10] sm:$0xff] }
  0x93   :  { %544 = vtanh.f32 %v136_v11  ;;  %vm176_vm6 = vcmp.eq.f32.partialorder %v172_v10, 0.0 }
  0x98   :  { %v543_v15 = vpop.eup %542 }
  0x99   :  { %v545_v16 = vpop.eup %544  ;;  %v100_v17 = vpop.f32.mrf.mxu0  ;;  %v145_v19 = vmul.f32 %v543_v15, %v144_v13  ;;  %v173_v15 = vld [vmem:[%s855_s2 + $0x18] sm:$0xff] }
  0x9a   :  { %v139_v18 = vpop.f32.mrf.mxu1  ;;  %546 = vtanh.f32 %v100_v17  ;;  %v162_v20 = vmul.f32 %v545_v16, %v161_v14  ;;  %v106_v27 = vpop.f32.mrf.mxu3  ;;  %vm177_vm7 = vcmp.eq.f32.partialorder %v173_v15, 0.0 }
  0x9b   :  { %548 = vtanh.f32 %v139_v18  ;;  %v149_v21 = vsel %vm67_vm0, %v145_v19, 0.0 }
  0x9c   :  { %v164_v22 = vsel %vm67_vm0, %v162_v20, 0.0  ;;  %150 = vadd.xlane.f32.xlu0 %v149_v21 }
  0x9d   :  { %165 = vadd.xlane.f32.xlu2 %v164_v22 }
  0xa0   :  { %v547_v23 = vpop.eup %546 }
  0xa1   :  { %v549_v24 = vpop.eup %548  ;;  %v103_v25 = vpop.f32.mrf.mxu0  ;;  %v146_v26 = vmul.f32 %v547_v23, %v144_v13 }
  0xa2   :  { %550 = vtanh.f32 %v103_v25  ;;  %v163_v28 = vmul.f32 %v549_v24, %v161_v14 }
  0xa3   :  { %v152_v29 = vsel %vm67_vm0, %v146_v26, 0.0  ;;  %552 = vtanh.f32 %v106_v27 }
  0xa4   :  { %v167_v30 = vsel %vm67_vm0, %v163_v28, 0.0  ;;  %153 = vadd.xlane.f32.xlu0 %v152_v29 }
  0xa5   :  { %168 = vadd.xlane.f32.xlu2 %v167_v30 }
  0xa8   :  { %v551_v31 = vpop.eup %550 }
  0xa9   :  { %v147_v32 = vmul.f32 %v551_v31, %v144_v13  ;;  %v553_v33 = vpop.eup %552 }
  0xaa   :  { %v148_v35 = vmul.f32 %v553_v33, %v144_v13 }
  0xab   :  { %v155_v34 = vsel %vm67_vm0, %v147_v32, 0.0 }
  0xac   :  { %156 = vadd.xlane.f32.xlu1 %v155_v34  ;;  %v158_v36 = vsel %vm67_vm0, %v148_v35, 0.0 }
  0xb4   :  { %159 = vadd.xlane.f32.xlu1 %v158_v36 }
 0x10f   :  { %v151_v38 = vpop.xlane.xlu0 %150 }
 0x110   :  { %v166_v39 = vpop.xlane.xlu2 %165  ;;  %v178_v47 = vsel %vm174_vm3, -1e+09, %v151_v38 }
 0x111   :  { %v186_v41 = vsel %vm184_vm1, -1e+09, %v166_v39  ;;  %v189_v53 = vsel %vm188_vm2, %v178_v47, -inf }
 0x112   :  { %v250_v42 = vsel %vm188_vm2, %v186_v41, -inf }
 0x113   :  { %v251_v44 = vrot.slane %v250_v42, 4 }
 0x115   :  { %v252_v46 = vmax.f32 %v250_v42, %v251_v44 }
 0x117   :  { %v253_v48 = vrot.slane %v252_v46, 2  ;;  %v154_v49 = vpop.xlane.xlu0 %153 }
 0x118   :  { %v169_v50 = vpop.xlane.xlu2 %168  ;;  %v179_v51 = vsel %vm175_vm4, -1e+09, %v154_v49 }
 0x119   :  { %v254_v52 = vmax.f32 %v252_v46, %v253_v48  ;;  %v187_v54 = vsel %vm185_vm5, -1e+09, %v169_v50  ;;  %v190_v55 = vsel %vm188_vm2, %v179_v51, -inf  ;;  %v656_v48 = vmov 0  }
 0x11a   :  { %v356_v56 = vsel %vm188_vm2, %v187_v54, -inf  ;;  %v191_v57 = vmax.f32 %v189_v53, %v190_v55  ;;  %540 = vset.pattern.permute.xlu1 %v656_v48  ;;  %539 = vset.pattern.permute.xlu0 %v656_v48 }
 0x11b   :  { %v255_v58 = vrot.slane %v254_v52, 1  ;;  %v357_v59 = vrot.slane %v356_v56, 4  ;;  %541 = vset.pattern.permute.xlu2 %v656_v48 }
 0x11c   :  { %v192_v60 = vrot.slane %v191_v57, 4 }
 0x11d   :  { %v256_v61 = vmax.f32 %v254_v52, %v255_v58  ;;  %v358_v62 = vmax.f32 %v356_v56, %v357_v59 }
 0x11e   :  { %v193_v63 = vmax.f32 %v191_v57, %v192_v60 }
 0x11f   :  { %v257_v0 = vsub.f32 %v186_v41, %v256_v61  ;;  %v359_v1 = vrot.slane %v358_v62, 2  ;;  %v157_v2 = vpop.xlane.xlu1 %156 }
 0x120   :  { %v194_v3 = vrot.slane %v193_v63, 2  ;;  %v180_v20 = vsel %vm176_vm6, -1e+09, %v157_v2 }
 0x121   :  { %v258_v11 = vmul.f32 1.442695, %v257_v0  ;;  %v360_v13 = vmax.f32 %v358_v62, %v359_v1  ;;  %v295_v27 = vsel %vm188_vm2, %v180_v20, -inf }
 0x122   :  { %v195_v14 = vmax.f32 %v193_v63, %v194_v3 }
 0x123   :  { %554 = vpow2.f32 %v258_v11  ;;  %v361_v16 = vrot.slane %v360_v13, 1 }
 0x124   :  { %v196_v17 = vrot.slane %v195_v14, 1 }
 0x125   :  { %v362_v18 = vmax.f32 %v360_v13, %v361_v16 }
 0x126   :  { %v197_v19 = vmax.f32 %v195_v14, %v196_v17 }
 0x127   :  { %v160_v21 = vpop.xlane.xlu1 %159  ;;  %v363_v26 = vsub.f32 %v187_v54, %v362_v18 }
 0x128   :  { %v198_v22 = vsub.f32 %v178_v47, %v197_v19  ;;  %v199_v23 = vsub.f32 %v179_v51, %v197_v19  ;;  %v181_v24 = vsel %vm177_vm7, -1e+09, %v160_v21 }
 0x129   :  { %v778_v25 = vpop.eup %554  ;;  %v296_v28 = vsel %vm188_vm2, %v181_v24, -inf  ;;  %v364_v36 = vmul.f32 1.442695, %v363_v26 }
 0x12a   :  { %v260_v29 = vsel %vm188_vm2, %v778_v25, 0.0  ;;  %v200_v30 = vmul.f32 1.442695, %v198_v22  ;;  %v202_v31 = vmul.f32 1.442695, %v199_v23  ;;  %v297_v32 = vmax.f32 %v295_v27, %v296_v28 }
 0x12b   :  { %v261_v33 = vrot.slane %v260_v29, 4 }
 0x12c   :  { %556 = vpow2.f32 %v200_v30  ;;  %v298_v34 = vrot.slane %v297_v32, 4 }
 0x12d   :  { %v262_v35 = vadd.f32 %v261_v33, %v260_v29  ;;  %558 = vpow2.f32 %v202_v31 }
 0x12e   :  { %v299_v37 = vmax.f32 %v297_v32, %v298_v34  ;;  %560 = vpow2.f32 %v364_v36 }
 0x12f   :  { %v263_v38 = vrot.slane %v262_v35, 2 }
 0x130   :  { %v300_v39 = vrot.slane %v299_v37, 2 }
 0x131   :  { %v264_v40 = vadd.f32 %v263_v38, %v262_v35 }
 0x132   :  { %v784_v41 = vpop.eup %556  ;;  %v301_v42 = vmax.f32 %v299_v37, %v300_v39 }
 0x133   :  { %v786_v43 = vpop.eup %558  ;;  %v265_v44 = vrot.slane %v264_v40, 1  ;;  %v204_v45 = vsel %vm188_vm2, %v784_v41, 0.0 }
 0x134   :  { %v205_v46 = vsel %vm188_vm2, %v786_v43, 0.0  ;;  %v302_v47 = vrot.slane %v301_v42, 1  ;;  %v792_v51 = vpop.eup %560 }
 0x135   :  { %v206_v49 = vadd.f32 %v205_v46, %v204_v45  ;;  %v794_v52 = vadd.f32 %v265_v44, %v264_v40  ;;  %v366_v57 = vsel %vm188_vm2, %v792_v51, 0.0 }
 0x136   :  { %v303_v50 = vmax.f32 %v301_v42, %v302_v47  ;;  %v367_v61 = vrot.slane %v366_v57, 4 }
 0x137   :  { %v207_v53 = vrot.slane %v206_v49, 4  ;;  %562 = vrcp.f32 %v794_v52  ;;  %v278_v40 = vand.u32 2147483648, %v794_v52  ;;  %vm272_vm13 = vweird.f32 %v794_v52 }
 0x138   :  { %v304_v54 = vsub.f32 %v180_v20, %v303_v50  ;;  %v305_v55 = vsub.f32 %v181_v24, %v303_v50  ;;  %v368_v1 = vadd.f32 %v367_v61, %v366_v57  ;;  %v276_v45 = vand.u32 2147483647, %v794_v52 }
 0x139   :  { %v208_v56 = vadd.f32 %v207_v53, %v206_v49 }
 0x13a   :  { %v306_v58 = vmul.f32 1.442695, %v304_v54  ;;  %v308_v59 = vmul.f32 1.442695, %v305_v55  ;;  %v369_v14 = vrot.slane %v368_v1, 2  ;;  %vm277_vm15 = vcmp.eq.f32.partialorder %v276_v45, 8.507059e+37 }
 0x13b   :  { %v209_v60 = vrot.slane %v208_v56, 2 }
 0x13c   :  { %564 = vpow2.f32 %v306_v58  ;;  %v370_v19 = vadd.f32 %v369_v14, %v368_v1  ;;  %v412_v14 = vld [vmem:[#allocation2 + $0x38] sm:$0xff] }
 0x13d   :  { %v210_v62 = vadd.f32 %v209_v60, %v208_v56  ;;  %566 = vpow2.f32 %v308_v59  ;;  %v563_v0 = vpop.eup %562  ;;  %456 = vmatpush.msrb.mxu3 %v412_v14 }
 0x13e   :  { %v268_v16 = vmul.f32 %v563_v0, %v794_v52  ;;  %v371_v26 = vrot.slane %v370_v19, 1  ;;  %vm273_vm12 = vweird.f32 %v563_v0 }
 0x13f   :  { %v211_v63 = vrot.slane %v210_v62, 1  ;;  %vm274_vm14 = vmor %vm272_vm13, %vm273_vm12 }
 0x140   :  { %v269_v22 = vsub.f32 1.0, %v268_v16  ;;  %v372_v34 = vadd.f32 %v371_v26, %v370_v19  ;;  %v410_v16 = vld [vmem:[#allocation2 + $0x28] sm:$0xff]  ;;  %v416_v19 = vld [vmem:[#allocation2 + $0x50] sm:$0xff] }
 0x141   :  { %v212_v2 = vadd.f32 %v211_v63, %v210_v62 }
 0x142   :  { %v799_v3 = vpop.eup %564  ;;  %v270_v31 = vmul.f32 %v563_v0, %v269_v22  ;;  %vm378_vm6 = vweird.f32 %v372_v34 }
 0x143   :  { %v801_v10 = vpop.eup %566  ;;  %568 = vrcp.f32 %v212_v2  ;;  %v310_v11 = vsel %vm188_vm2, %v799_v3, 0.0  ;;  %v224_v28 = vand.u32 2147483648, %v212_v2  ;;  %v222_v30 = vand.u32 2147483647, %v212_v2 }
 0x144   :  { %v311_v13 = vsel %vm188_vm2, %v801_v10, 0.0  ;;  %vm218_vm9 = vweird.f32 %v212_v2  ;;  %v271_v38 = vadd.f32 %v563_v0, %v270_v31 }
 0x145   :  { %v312_v15 = vadd.f32 %v311_v13, %v310_v11  ;;  %v225_v36 = vor.u32 1.1754944e-38, %v224_v28  ;;  %vm223_vm11 = vcmp.eq.f32.partialorder %v222_v30, 8.507059e+37 }
 0x146   :  { %v275_v46 = vsel %vm274_vm14, %v563_v0, %v271_v38  ;;  %v384_v0 = vand.u32 2147483648, %v372_v34 }
 0x147   :  { %v313_v17 = vrot.slane %v312_v15, 4 }
 0x149   :  { %v569_v18 = vpop.eup %568  ;;  %v314_v20 = vadd.f32 %v313_v17, %v312_v15  ;;  %v411_v15 = vld [vmem:[#allocation2 + $0x30] sm:$0xff]  ;;  %v417_v17 = vld [vmem:[#allocation2 + $0x58] sm:$0xff] }
 0x14a   :  { %v214_v21 = vmul.f32 %v569_v18, %v212_v2  ;;  %vm219_vm8 = vweird.f32 %v569_v18  ;;  %v382_v2 = vand.u32 2147483647, %v372_v34  ;;  %457 = vmatpush.msrb.mxu3 %v411_v15  ;;  %433 = vmatpush.msra.mxu2 %v417_v17  ;;  %v472_v15 = vperm.slane %v746_v12, 3 }
 0x14b   :  { %v315_v23 = vrot.slane %v314_v20, 2  ;;  %vm220_vm10 = vmor %vm218_vm9, %vm219_vm8 }
 0x14c   :  { %v215_v24 = vsub.f32 1.0, %v214_v21  ;;  %vm383_vm9 = vcmp.eq.f32.partialorder %v382_v2, 8.507059e+37  ;;  %458 = vmatpush.msrb.mxu3 %v410_v16  ;;  %434 = vmatpush.msra.mxu2 %v416_v19  ;;  %v414_v21 = vld [vmem:[#allocation2 + $0x40] sm:$0xff]  ;;  %v464_v2 = vperm.slane %v746_v12, 2 }
 0x14d   :  { %v316_v27 = vadd.f32 %v315_v23, %v314_v20  ;;  %v415_v20 = vld [vmem:[#allocation2 + $0x48] sm:$0xff] }
 0x14e   :  { %v216_v29 = vmul.f32 %v569_v18, %v215_v24  ;;  %435 = vmatpush.msra.mxu2 %v415_v20 }
 0x14f   :  { %v317_v32 = vrot.slane %v316_v27, 1 }
 0x150   :  { %v217_v33 = vadd.f32 %v569_v18, %v216_v29  ;;  %436 = vmatpush.msra.mxu2 %v414_v21 }
 0x151   :  { %v318_v35 = vadd.f32 %v317_v32, %v316_v27 }
 0x152   :  { %v221_v37 = vsel %vm220_vm10, %v569_v18, %v217_v33  ;;  %v409_v18 = vld [vmem:[#allocation2 + $0x20] sm:$0xff]  ;;  %vm496_vm10 = vcmask 254976  }
 0x153   :  { %570 = vrcp.f32 %v318_v35  ;;  %v226_v39 = vsel %vm223_vm11, %v225_v36, %v221_v37  ;;  %v330_v53 = vand.u32 2147483648, %v318_v35  ;;  %v328_v55 = vand.u32 2147483647, %v318_v35  ;;  %459 = vmatpush.msrb.mxu3 %v409_v18 }
 0x154   :  { %v227_v42 = vmul.f32 %v784_v41, %v226_v39  ;;  %v228_v44 = vmul.f32 %v786_v43, %v226_v39  ;;  %572 = vrcp.f32 %v372_v34  ;;  %v279_v41 = vor.u32 1.1754944e-38, %v278_v40 }
 0x155   :  { %vm324_vm3 = vweird.f32 %v318_v35  ;;  %v331_v58 = vor.u32 1.1754944e-38, %v330_v53  ;;  %vm329_vm5 = vcmp.eq.f32.partialorder %v328_v55, 8.507059e+37 }
 0x156   :  { %231 = vperm.xlu0 %539, %v227_v42   ;;  %404 = vst.msk [vmem:[%s860_s7] sm:$0xff] %vm188_vm2, %v227_v42  ;;  %236 = vperm.xlu1 %540, %v228_v44   ;;  %v280_v47 = vsel %vm277_vm15, %v279_v41, %v275_v46 }
 0x157   :  { %405 = vst.msk [vmem:[%s860_s7 + $0x8] sm:$0xff] %vm188_vm2, %v228_v44  ;;  %v281_v50 = vmul.f32 %v778_v25, %v280_v47 }
 0x159   :  { %v571_v43 = vpop.eup %570 }
 0x15a   :  { %v320_v48 = vmul.f32 %v571_v43, %v318_v35  ;;  %v573_v49 = vpop.eup %572  ;;  %vm325_vm1 = vweird.f32 %v571_v43 }
 0x15b   :  { %v374_v56 = vmul.f32 %v573_v49, %v372_v34  ;;  %vm326_vm4 = vmor %vm324_vm3, %vm325_vm1  ;;  %vm379_vm7 = vweird.f32 %v573_v49 }
 0x15c   :  { %v321_v52 = vsub.f32 1.0, %v320_v48  ;;  %vm380_vm8 = vmor %vm378_vm6, %vm379_vm7 }
 0x15d   :  { %v375_v60 = vsub.f32 1.0, %v374_v56 }
 0x15e   :  { %284 = vperm.xlu1 %540, %v281_v50   ;;  %v322_v54 = vmul.f32 %v571_v43, %v321_v52 }
 0x15f   :  { %v376_v25 = vmul.f32 %v573_v49, %v375_v60 }
 0x160   :  { %v323_v57 = vadd.f32 %v571_v43, %v322_v54 }
 0x161   :  { %v377_v1 = vadd.f32 %v573_v49, %v376_v25  ;;  %v470_v25 = vld [vmem:[#allocation2 + $0x70] sm:$0xff] }
 0x162   :  { %v327_v59 = vsel %vm326_vm4, %v571_v43, %v323_v57 }
 0x163   :  { %v332_v61 = vsel %vm329_vm5, %v331_v58, %v327_v59 }
 0x164   :  { %v333_v62 = vmul.f32 %v799_v3, %v332_v61  ;;  %v334_v63 = vmul.f32 %v801_v10, %v332_v61  ;;  %v385_v3 = vor.u32 1.1754944e-38, %v384_v0  ;;  %v381_v10 = vsel %vm380_vm8, %v573_v49, %v377_v1  ;;  %v469_v0 = vld [vmem:[#allocation2 + $0x68] sm:$0xff]  ;;  %v468_v1 = vld [vmem:[#allocation2 + $0x60] sm:$0xff] }
 0x166   :  { %337 = vperm.xlu2 %541, %v333_v62   ;;  %406 = vst.msk [vmem:[%s860_s7 + $0x10] sm:$0xff] %vm188_vm2, %v333_v62  ;;  %v386_v11 = vsel %vm383_vm9, %v385_v3, %v381_v10 }
 0x167   :  { %407 = vst.msk [vmem:[%s860_s7 + $0x18] sm:$0xff] %vm188_vm2, %v334_v63  ;;  %v387_v13 = vmul.f32 %v792_v51, %v386_v11  ;;  %vm401_vm2 = vcmask 1040384   ;;  %s657_s7 = smov [#allocation7]  }
 0x168   :  { %s503_s14 = sshll.u32 %s657_s7, 4  ;;  %s504_s14 = int_to_ptr.vmem [resolvable:$true] %s503_s14 }
 0x16e   :  { %342 = vperm.xlu2 %541, %v334_v63   ;;  %v471_v63 = vld [vmem:[#allocation2 + $0x78] sm:$0xff] }
 0x16f   :  { %488 = vmatpush.msrb.mxu2 %v471_v63 }
 0x171   :  { %489 = vmatpush.msrb.mxu2 %v470_v25 }
 0x173   :  { %490 = vmatpush.msrb.mxu2 %v469_v0 }
 0x175   :  { %491 = vmatpush.msrb.mxu2 %v468_v1 }
 0x176   :  { %390 = vperm.xlu2 %541, %v387_v13  }
 0x1c0   :  { %v338_v22 = vpop.permute.xlu2 %337 }
 0x1c1   :  { %v345_v51 = vmul.f32 %v338_v22, %v742_v9 }
 0x1c3   :  { %v347_v30 = vsel %vm67_vm0, %v345_v51, 0.0 }
 0x1c8   :  { %v232_v23 = vpop.permute.xlu0 %231  ;;  %v343_v24 = vpop.permute.xlu2 %342 }
 0x1c9   :  { %v239_v26 = vmul.f32 %v232_v23, %v707_v4  ;;  %v346_v27 = vmul.f32 %v343_v24, %v717_v6  ;;  %v237_v28 = vpop.permute.xlu1 %236 }
 0x1ca   :  { %v240_v29 = vmul.f32 %v237_v28, %v728_v7 }
 0x1cb   :  { %v241_v31 = vsel %vm67_vm0, %v239_v26, 0.0  ;;  %v348_v32 = vsel %vm67_vm0, %v346_v27, 0.0 }
 0x1cc   :  { %v349_v33 = vadd.f32 %v348_v32, %v347_v30  ;;  %v242_v34 = vsel %vm67_vm0, %v240_v29, 0.0 }
 0x1cd   :  { %v243_v35 = vadd.f32 %v242_v34, %v241_v31 }
 0x1ce   :  { %v350_v9 = vrot.slane %v349_v33, 4 }
 0x1cf   :  { %v244_v36 = vrot.slane %v243_v35, 4 }
 0x1d0   :  { %v351_v37 = vadd.f32 %v350_v9, %v349_v33  ;;  %v391_v38 = vpop.permute.xlu2 %390 }
 0x1d1   :  { %v245_v4 = vadd.f32 %v244_v36, %v243_v35  ;;  %v393_v6 = vmul.f32 %v391_v38, %v733_v8  ;;  %v285_v39 = vpop.permute.xlu1 %284 }
 0x1d2   :  { %v352_v40 = vrot.slane %v351_v37, 2  ;;  %v287_v7 = vmul.f32 %v285_v39, %v712_v5 }
 0x1d3   :  { %v246_v42 = vrot.slane %v245_v4, 2  ;;  %v394_v44 = vsel %vm67_vm0, %v393_v6, 0.0 }
 0x1d4   :  { %v353_v45 = vadd.f32 %v352_v40, %v351_v37  ;;  %v395_v46 = vrot.slane %v394_v44, 4  ;;  %v288_v41 = vsel %vm67_vm0, %v287_v7, 0.0 }
 0x1d5   :  { %v247_v43 = vadd.f32 %v246_v42, %v245_v4  ;;  %v289_v47 = vrot.slane %v288_v41, 4 }
 0x1d6   :  { %v354_v48 = vrot.slane %v353_v45, 1  ;;  %v396_v49 = vadd.f32 %v395_v46, %v394_v44 }
 0x1d7   :  { %v248_v50 = vrot.slane %v247_v43, 1  ;;  %v290_v52 = vadd.f32 %v289_v47, %v288_v41 }
 0x1d8   :  { %v397_v53 = vrot.slane %v396_v49, 2  ;;  %v355_v54 = vadd.f32 %v354_v48, %v353_v45 }
 0x1d9   :  { %v291_v8 = vrot.slane %v290_v52, 2  ;;  %v249_v55 = vadd.f32 %v248_v50, %v247_v43 }
 0x1da   :  { %v398_v56 = vadd.f32 %v397_v53, %v396_v49 }
 0x1db   :  { %v292_v5 = vadd.f32 %v291_v8, %v290_v52  ;;  %v402_v57 = vsel %vm401_vm2, %v249_v55, %v355_v54 }
 0x1dc   :  { %v399_v58 = vrot.slane %v398_v56, 1  ;;  %527 = vmatmul.msk.f32.vlgmr.msrb.gmra.mxu3 %vm67_vm0, %v402_v57 }
 0x1dd   :  { %v293_v59 = vrot.slane %v292_v5, 1 }
 0x1de   :  { %v400_v60 = vadd.f32 %v399_v58, %v398_v56 }
 0x1df   :  { %v294_v61 = vadd.f32 %v293_v59, %v292_v5 }
 0x1e1   :  { %v403_v62 = vsel %vm401_vm2, %v294_v61, %v400_v60 }
 0x1e2   :  { %526 = vmatmul.msk.f32.vlgmr.msra.gmra.mxu2 %vm67_vm0, %v403_v62 }
 0x25f   :  { %v461_v3 = vpop.f32.mrf.mxu3 }
 0x265   :  { %v438_v10 = vpop.f32.mrf.mxu2 }
 0x266   :  { %v462_v11 = vadd.f32 %v461_v3, %v438_v10 }
 0x268   :  { %v465_v13 = vadd.f32 %v464_v2, %v462_v11 }
 0x26a   :  { %v466_v14 = vmax.f32 %v465_v13, 0.0 }
 0x26c   :  { %528 = vmatmul.msk.f32.vlgmr.msrb.gmra.mxu2 %vm67_vm0, %v466_v14 }
 0x2ef   :  { %v493_v16 = vpop.f32.mrf.mxu2 }
 0x2f0   :  { %v494_v17 = vadd.f32 %v493_v16, %v472_v15 }
 0x2f2   :  { %497 = vst.msk [vmem:[#allocation7] sm:$0x3] %vm496_vm10, %v494_v17 }
 0x2f3   :  { %508 = dma.vmem_to_hbm [thread:$0]  %s504_s14, 32, %s506_s17, [#allocation4]  }
 0x2f4   :  { %650 = dma.done.wait [#allocation4], 32  }
 0x2f5   :  { %651 = vsyncadd [#allocation4], 4294967264 }
 0x2f6   :  { %517 = vsyncpa [#allocation3], 1 }
 0x2f7   :  { %518 = vsyncpa [#allocation6], 1 }
 0x2f8   :  { %519 = vsyncpa [#allocation4], 1 }

</bundles_post_ra>
